<compile_context>
chip_gen: v7x
topology: tpu7x:2x2x1
jax: 0.10.0
libtpu: 0.0.40
codegen_flags: <defaults>
</compile_context>

<pallas_src>
import jax
import jax.numpy as jnp
from jax import lax
from jax.experimental import pallas as pl
from jax.experimental.pallas import tpu as pltpu


def _round_up(x, m):
    return (x + m - 1) // m * m


# ---------------------------------------------------------------------------
# Path 1: VMEM-resident table, leading-axis gather (small vocab).
# ---------------------------------------------------------------------------

def _resident_gather_kernel(ids_ref, table_ref, out_ref):
    """out[j, :] = table[ids[base + j], 0, :] for one tile of tokens.

    ids_ref  : SMEM (N_pad,) int32   -- scalar-prefetched token ids
    table_ref: VMEM (V, 1, D)        -- whole table, resident (constant index_map)
    out_ref  : VMEM (TILE, D)        -- lane-dense output block
    """
    tile = out_ref.shape[0]
    base = pl.program_id(0) * tile
    # Statically unrolled row copies: the table index is dynamic only on the
    # leading (untiled) axis -> pure scalar address math; every output store
    # has a static sublane offset.  No DMAs, no semaphore waits at all.
    # (Tile is capped at 256 in the wrapper to keep the unrolled body small.)
    for j in range(tile):
        row = ids_ref[base + j]
        out_ref[pl.ds(j, 1), :] = table_ref[row]


def _gather_vmem_resident(ids_flat, emb_table, tile_tokens):
    n_pad = ids_flat.shape[0]
    vocab, dim = emb_table.shape
    n_tiles = n_pad // tile_tokens
    itemsize = jnp.dtype(emb_table.dtype).itemsize

    # (V, 1, D): vocab becomes a leading, untiled dimension so the in-kernel
    # gather never needs dynamic sublane indexing.  Each row occupies one
    # padded (sublane x 128-lane) slab per 128 lanes of D (~4 KiB / 128 lanes).
    table3 = emb_table[:, None, :]
    resident_bytes = vocab * ((dim + 127) // 128) * 4096

    vmem_limit = int(max(32 * 2**20,
                         min(96 * 2**20,
                             2 * resident_bytes
                             + 4 * tile_tokens * dim * itemsize + (2 << 20))))

    cost = pl.CostEstimate(
        flops=0,
        transcendentals=0,
        bytes_accessed=(vocab * dim + n_pad * dim) * itemsize + n_pad * 4,
    )

    return pl.pallas_call(
        _resident_gather_kernel,
        out_shape=jax.ShapeDtypeStruct((n_pad, dim), emb_table.dtype),
        grid_spec=pltpu.PrefetchScalarGridSpec(
            num_scalar_prefetch=1,                                  # ids -> SMEM
            grid=(n_tiles,),
            in_specs=[pl.BlockSpec((vocab, 1, dim), lambda i, ids: (0, 0, 0))],
            out_specs=pl.BlockSpec((tile_tokens, dim), lambda i, ids: (i, 0)),
        ),
        compiler_params=pltpu.CompilerParams(
            # No cross-step scratch carry -> tiles are independent and can be
            # split across megacore / v7x's two TensorCores.
            dimension_semantics=("parallel",),
            vmem_limit_bytes=vmem_limit,
        ),
        cost_estimate=cost,
    )(ids_flat, table3)


# ---------------------------------------------------------------------------
# Path 2: table stays in HBM, manual multi-buffered per-row DMA gather.
# ---------------------------------------------------------------------------

_NSLOTS = 3          # landing buffers -> 2 tiles of lookahead (was 2 / 1)
_ISSUE_UNROLL = 8    # keep the DMA-descriptor (vector-misc) slot fed


def _hbm_gather_kernel(ids_ref, emb_hbm, out_ref, rows_ref, sem_ref):
    """Gather one tile of embedding rows from the HBM table.

    ids_ref : SMEM (N_pad,) int32       -- scalar-prefetched token ids
    emb_hbm : ANY  (V, D)               -- embedding table, left in HBM
    out_ref : VMEM (TILE, D)            -- output block for this grid step
    rows_ref: VMEM (NSLOTS, TILE, D)    -- DMA landing slots
    sem_ref : DMA semaphores (NSLOTS,)  -- one per slot
    """
    tile = out_ref.shape[0]
    nslots = rows_ref.shape[0]
    lookahead = nslots - 1
    i = pl.program_id(0)
    n = pl.num_programs(0)

    def fetch_tile(tile_idx, slot):
        base = tile_idx * tile

        def issue(j, carry):
            # SMEM id reads happen here, strictly before any wait this step
            # (review: .wait() breaks SMEM sst->sld forwarding).
            row = ids_ref[base + j]
            pltpu.make_async_copy(
                emb_hbm.at[pl.ds(row, 1), :],
                rows_ref.at[slot, pl.ds(j, 1), :],
                sem_ref.at[slot],
            ).start()
            return carry

        lax.fori_loop(0, tile, issue, 0, unroll=_ISSUE_UNROLL)

    # Prologue: prime `lookahead` tiles before the first drain.
    for t in range(lookahead):
        @pl.when((i == 0) & (t < n))
        def _(t=t):
            fetch_tile(t, t)

    slot = i % nslots

    # Prefetch `lookahead` tiles ahead, into the slot drained at step i-1.
    nxt = i + lookahead

    @pl.when(nxt < n)
    def _():
        fetch_tile(nxt, nxt % nslots)

    # ONE wait per slot (was: one wait per row).  DMA semaphores count bytes,
    # so a wait sized to the whole (TILE, D) slot buffer consumes exactly the
    # TILE per-row copy completions issued for this slot.  Padded tail ids are
    # therefore fetched (row 0) rather than skipped, keeping start/wait byte
    # counts identical.
    pltpu.make_async_copy(
        rows_ref.at[slot], rows_ref.at[slot], sem_ref.at[slot]
    ).wait()

    # Lane-dense vector store into the pipelined output block.
    out_ref[...] = rows_ref[slot]


def _gather_hbm(ids_flat, emb_table, tile_tokens):
    n_pad = ids_flat.shape[0]
    vocab, dim = emb_table.shape
    n_tiles = n_pad // tile_tokens
    itemsize = jnp.dtype(emb_table.dtype).itemsize

    vmem_limit = int(max(32 * 2**20,
                         min(96 * 2**20,
                             (_NSLOTS + 2) * tile_tokens * dim * itemsize
                             + (4 << 20))))

    cost = pl.CostEstimate(
        flops=0,
        transcendentals=0,
        bytes_accessed=2 * n_pad * dim * itemsize + n_pad * 4,
    )

    return pl.pallas_call(
        _hbm_gather_kernel,
        out_shape=jax.ShapeDtypeStruct((n_pad, dim), emb_table.dtype),
        grid_spec=pltpu.PrefetchScalarGridSpec(
            num_scalar_prefetch=1,                          # ids -> SMEM
            grid=(n_tiles,),
            in_specs=[pl.BlockSpec(memory_space=pl.ANY)],   # table stays in HBM
            out_specs=pl.BlockSpec((tile_tokens, dim), lambda i, ids: (i, 0)),
            scratch_shapes=[
                pltpu.VMEM((_NSLOTS, tile_tokens, dim), emb_table.dtype),
                pltpu.SemaphoreType.DMA((_NSLOTS,)),
            ],
        ),
        compiler_params=pltpu.CompilerParams(
            # Landing slots carry across grid steps -> axis must stay
            # sequential.  (v7x: an explicit 2-TC split of this axis via a
            # leading parallel dim is a further optimization, not done here.)
            dimension_semantics=("arbitrary",),
            vmem_limit_bytes=vmem_limit,
        ),
        cost_estimate=cost,
    )(ids_flat, emb_table)


# ---------------------------------------------------------------------------
# Wrapper: WordEncoder.forward
# ---------------------------------------------------------------------------

def word_encoder_forward(indices, emb_table, *, tile_tokens=1024,
                         vmem_table_budget_bytes=8 * 2**20):
    """indices: (B, S) int, emb_table: (V, D) -> (B, S, D) gathered rows."""
    batch, seq = indices.shape
    vocab, dim = emb_table.shape
    n = batch * seq

    # Clamp (rather than crash) out-of-range ids; PyTorch's nn.Embedding would
    # raise — this is a deliberate safety net so a bad id can never address an
    # arbitrary table row.
    ids = jnp.clip(indices.reshape(n).astype(jnp.int32), 0, vocab - 1)

    # Pick the path by the table's padded VMEM footprint (conservative enough
    # to also hold on v7x's smaller VMEM).
    resident_bytes = vocab * ((dim + 127) // 128) * 4096
    use_resident = resident_bytes <= vmem_table_budget_bytes

    if use_resident:
        # Row copies are statically unrolled; there is no DMA bookkeeping to
        # amortise on this path, so 256 tokens/step is already efficient and
        # keeps the kernel body small.
        tile = min(256, tile_tokens)
    else:
        # HBM gather path: big tiles amortise the ~0.35us per-step overhead and
        # keep more row DMAs in flight (review item #1).
        tile = tile_tokens
    tile = max(8, min(_round_up(tile, 8), _round_up(n, 8)))

    n_pad = _round_up(n, tile)
    ids = jnp.pad(ids, (0, n_pad - n))      # padded ids -> row 0, sliced off below

    if use_resident:
        out_flat = _gather_vmem_resident(ids, emb_table, tile)
    else:
        out_flat = _gather_hbm(ids, emb_table, tile)

    return out_flat[:n].reshape(batch, seq, dim)


if __name__ == "__main__":
    key = jax.random.PRNGKey(0)
    k_emb, k_idx = jax.random.split(key)

    # Synthetic "pretrained" embeddings: vocab=32, dim=128 (lane-dense), pad_idx=0.
    V, D = 32, 128
    pad_idx = 0
    emb_table = jax.random.normal(k_emb, (V, D), dtype=jnp.float32)

    # Token ids: batch=2, seq=8, with a couple of explicit pad tokens.
    B, S = 2, 8
    x = jax.random.randint(k_idx, (B, S), 0, V, dtype=jnp.int32)
    x = x.at[0, -1].set(pad_idx).at[1, -2:].set(pad_idx)

    fwd = jax.jit(word_encoder_forward)
    out = jax.block_until_ready(fwd(x, emb_table))

    # Reference: pure JAX gather (same as nn.Embedding.from_pretrained forward).
    ref = emb_table[x]
    assert out.shape == (B, S, D)
    assert jnp.array_equal(out, ref), "mismatch vs reference gather"

    print("KERNEL_OK")
</pallas_src>

<mosaic_0001>
module attributes {stable_mosaic.version = 11 : i64} {
  func.func @_resident_gather_kernel(%arg0: i32, %arg1: memref<16xi32, #tpu.memory_space<smem>>, %arg2: memref<32x1x128xf32, #tpu.memory_space<vmem>>, %arg3: memref<16x128xf32, #tpu.memory_space<vmem>>) attributes {dimension_semantics = [#tpu.dimension_semantics<parallel>], iteration_bounds = array<i64: 1>, scalar_prefetch = 1 : i64, scratch_operands = 0 : i64, tpu.core_type = #tpu.core_type<tc>, window_params = [{pipeline_mode = #tpu.pipeline_mode<synchronous>, transform_indices = @transform_0, window_bounds = array<i64: 32, 1, 128>}, {transform_indices = @transform_1, window_bounds = array<i64: 16, 128>}]} {
    %c16_i32 = arith.constant 16 : i32
    %0 = arith.muli %arg0, %c16_i32 : i32
    %c0_i32 = arith.constant 0 : i32
    %1 = arith.addi %0, %c0_i32 : i32
    %2 = arith.index_cast %1 : i32 to index
    %3 = memref.load %arg1[%2] : memref<16xi32, #tpu.memory_space<smem>>
    %4 = arith.index_cast %3 : i32 to index
    %c0 = arith.constant 0 : index
    %c0_0 = arith.constant 0 : index
    %5 = vector.load %arg2[%4, %c0, %c0_0] : memref<32x1x128xf32, #tpu.memory_space<vmem>>, vector<1x1x128xf32>
    %6 = vector.shape_cast %5 : vector<1x1x128xf32> to vector<1x128xf32>
    %c0_1 = arith.constant 0 : index
    %c0_2 = arith.constant 0 : index
    %7 = vector.load %arg3[%c0_1, %c0_2] : memref<16x128xf32, #tpu.memory_space<vmem>>, vector<1x128xf32>
    tpu.vector_store %arg3[%c0_1, %c0_2], %6 {strides = array<i32>} : memref<16x128xf32, #tpu.memory_space<vmem>>, vector<1x128xf32>,
    %c1_i32 = arith.constant 1 : i32
    %8 = arith.addi %0, %c1_i32 : i32
    %9 = arith.index_cast %8 : i32 to index
    %10 = memref.load %arg1[%9] : memref<16xi32, #tpu.memory_space<smem>>
    %11 = arith.index_cast %10 : i32 to index
    %c0_3 = arith.constant 0 : index
    %c0_4 = arith.constant 0 : index
    %12 = vector.load %arg2[%11, %c0_3, %c0_4] : memref<32x1x128xf32, #tpu.memory_space<vmem>>, vector<1x1x128xf32>
    %13 = vector.shape_cast %12 : vector<1x1x128xf32> to vector<1x128xf32>
    %c1 = arith.constant 1 : index
    %c0_5 = arith.constant 0 : index
    %14 = vector.load %arg3[%c1, %c0_5] : memref<16x128xf32, #tpu.memory_space<vmem>>, vector<1x128xf32>
    tpu.vector_store %arg3[%c1, %c0_5], %13 {strides = array<i32>} : memref<16x128xf32, #tpu.memory_space<vmem>>, vector<1x128xf32>,
    %c2_i32 = arith.constant 2 : i32
    %15 = arith.addi %0, %c2_i32 : i32
    %16 = arith.index_cast %15 : i32 to index
    %17 = memref.load %arg1[%16] : memref<16xi32, #tpu.memory_space<smem>>
    %18 = arith.index_cast %17 : i32 to index
    %c0_6 = arith.constant 0 : index
    %c0_7 = arith.constant 0 : index
    %19 = vector.load %arg2[%18, %c0_6, %c0_7] : memref<32x1x128xf32, #tpu.memory_space<vmem>>, vector<1x1x128xf32>
    %20 = vector.shape_cast %19 : vector<1x1x128xf32> to vector<1x128xf32>
    %c2 = arith.constant 2 : index
    %c0_8 = arith.constant 0 : index
    %21 = vector.load %arg3[%c2, %c0_8] : memref<16x128xf32, #tpu.memory_space<vmem>>, vector<1x128xf32>
    tpu.vector_store %arg3[%c2, %c0_8], %20 {strides = array<i32>} : memref<16x128xf32, #tpu.memory_space<vmem>>, vector<1x128xf32>,
    %c3_i32 = arith.constant 3 : i32
    %22 = arith.addi %0, %c3_i32 : i32
    %23 = arith.index_cast %22 : i32 to index
    %24 = memref.load %arg1[%23] : memref<16xi32, #tpu.memory_space<smem>>
    %25 = arith.index_cast %24 : i32 to index
    %c0_9 = arith.constant 0 : index
    %c0_10 = arith.constant 0 : index
    %26 = vector.load %arg2[%25, %c0_9, %c0_10] : memref<32x1x128xf32, #tpu.memory_space<vmem>>, vector<1x1x128xf32>
    %27 = vector.shape_cast %26 : vector<1x1x128xf32> to vector<1x128xf32>
    %c3 = arith.constant 3 : index
    %c0_11 = arith.constant 0 : index
    %28 = vector.load %arg3[%c3, %c0_11] : memref<16x128xf32, #tpu.memory_space<vmem>>, vector<1x128xf32>
    tpu.vector_store %arg3[%c3, %c0_11], %27 {strides = array<i32>} : memref<16x128xf32, #tpu.memory_space<vmem>>, vector<1x128xf32>,
    %c4_i32 = arith.constant 4 : i32
    %29 = arith.addi %0, %c4_i32 : i32
    %30 = arith.index_cast %29 : i32 to index
    %31 = memref.load %arg1[%30] : memref<16xi32, #tpu.memory_space<smem>>
    %32 = arith.index_cast %31 : i32 to index
    %c0_12 = arith.constant 0 : index
    %c0_13 = arith.constant 0 : index
    %33 = vector.load %arg2[%32, %c0_12, %c0_13] : memref<32x1x128xf32, #tpu.memory_space<vmem>>, vector<1x1x128xf32>
    %34 = vector.shape_cast %33 : vector<1x1x128xf32> to vector<1x128xf32>
    %c4 = arith.constant 4 : index
    %c0_14 = arith.constant 0 : index
    %35 = vector.load %arg3[%c4, %c0_14] : memref<16x128xf32, #tpu.memory_space<vmem>>, vector<1x128xf32>
    tpu.vector_store %arg3[%c4, %c0_14], %34 {strides = array<i32>} : memref<16x128xf32, #tpu.memory_space<vmem>>, vector<1x128xf32>,
    %c5_i32 = arith.constant 5 : i32
    %36 = arith.addi %0, %c5_i32 : i32
    %37 = arith.index_cast %36 : i32 to index
    %38 = memref.load %arg1[%37] : memref<16xi32, #tpu.memory_space<smem>>
    %39 = arith.index_cast %38 : i32 to index
    %c0_15 = arith.constant 0 : index
    %c0_16 = arith.constant 0 : index
    %40 = vector.load %arg2[%39, %c0_15, %c0_16] : memref<32x1x128xf32, #tpu.memory_space<vmem>>, vector<1x1x128xf32>
    %41 = vector.shape_cast %40 : vector<1x1x128xf32> to vector<1x128xf32>
    %c5 = arith.constant 5 : index
    %c0_17 = arith.constant 0 : index
    %42 = vector.load %arg3[%c5, %c0_17] : memref<16x128xf32, #tpu.memory_space<vmem>>, vector<1x128xf32>
    tpu.vector_store %arg3[%c5, %c0_17], %41 {strides = array<i32>} : memref<16x128xf32, #tpu.memory_space<vmem>>, vector<1x128xf32>,
    %c6_i32 = arith.constant 6 : i32
    %43 = arith.addi %0, %c6_i32 : i32
    %44 = arith.index_cast %43 : i32 to index
    %45 = memref.load %arg1[%44] : memref<16xi32, #tpu.memory_space<smem>>
    %46 = arith.index_cast %45 : i32 to index
    %c0_18 = arith.constant 0 : index
    %c0_19 = arith.constant 0 : index
    %47 = vector.load %arg2[%46, %c0_18, %c0_19] : memref<32x1x128xf32, #tpu.memory_space<vmem>>, vector<1x1x128xf32>
    %48 = vector.shape_cast %47 : vector<1x1x128xf32> to vector<1x128xf32>
    %c6 = arith.constant 6 : index
    %c0_20 = arith.constant 0 : index
    %49 = vector.load %arg3[%c6, %c0_20] : memref<16x128xf32, #tpu.memory_space<vmem>>, vector<1x128xf32>
    tpu.vector_store %arg3[%c6, %c0_20], %48 {strides = array<i32>} : memref<16x128xf32, #tpu.memory_space<vmem>>, vector<1x128xf32>,
    %c7_i32 = arith.constant 7 : i32
    %50 = arith.addi %0, %c7_i32 : i32
    %51 = arith.index_cast %50 : i32 to index
    %52 = memref.load %arg1[%51] : memref<16xi32, #tpu.memory_space<smem>>
    %53 = arith.index_cast %52 : i32 to index
    %c0_21 = arith.constant 0 : index
    %c0_22 = arith.constant 0 : index
    %54 = vector.load %arg2[%53, %c0_21, %c0_22] : memref<32x1x128xf32, #tpu.memory_space<vmem>>, vector<1x1x128xf32>
    %55 = vector.shape_cast %54 : vector<1x1x128xf32> to vector<1x128xf32>
    %c7 = arith.constant 7 : index
    %c0_23 = arith.constant 0 : index
    %56 = vector.load %arg3[%c7, %c0_23] : memref<16x128xf32, #tpu.memory_space<vmem>>, vector<1x128xf32>
    tpu.vector_store %arg3[%c7, %c0_23], %55 {strides = array<i32>} : memref<16x128xf32, #tpu.memory_space<vmem>>, vector<1x128xf32>,
    %c8_i32 = arith.constant 8 : i32
    %57 = arith.addi %0, %c8_i32 : i32
    %58 = arith.index_cast %57 : i32 to index
    %59 = memref.load %arg1[%58] : memref<16xi32, #tpu.memory_space<smem>>
    %60 = arith.index_cast %59 : i32 to index
    %c0_24 = arith.constant 0 : index
    %c0_25 = arith.constant 0 : index
    %61 = vector.load %arg2[%60, %c0_24, %c0_25] : memref<32x1x128xf32, #tpu.memory_space<vmem>>, vector<1x1x128xf32>
    %62 = vector.shape_cast %61 : vector<1x1x128xf32> to vector<1x128xf32>
    %c8 = arith.constant 8 : index
    %c0_26 = arith.constant 0 : index
    %63 = vector.load %arg3[%c8, %c0_26] : memref<16x128xf32, #tpu.memory_space<vmem>>, vector<1x128xf32>
    tpu.vector_store %arg3[%c8, %c0_26], %62 {strides = array<i32>} : memref<16x128xf32, #tpu.memory_space<vmem>>, vector<1x128xf32>,
    %c9_i32 = arith.constant 9 : i32
    %64 = arith.addi %0, %c9_i32 : i32
    %65 = arith.index_cast %64 : i32 to index
    %66 = memref.load %arg1[%65] : memref<16xi32, #tpu.memory_space<smem>>
    %67 = arith.index_cast %66 : i32 to index
    %c0_27 = arith.constant 0 : index
    %c0_28 = arith.constant 0 : index
    %68 = vector.load %arg2[%67, %c0_27, %c0_28] : memref<32x1x128xf32, #tpu.memory_space<vmem>>, vector<1x1x128xf32>
    %69 = vector.shape_cast %68 : vector<1x1x128xf32> to vector<1x128xf32>
    %c9 = arith.constant 9 : index
    %c0_29 = arith.constant 0 : index
    %70 = vector.load %arg3[%c9, %c0_29] : memref<16x128xf32, #tpu.memory_space<vmem>>, vector<1x128xf32>
    tpu.vector_store %arg3[%c9, %c0_29], %69 {strides = array<i32>} : memref<16x128xf32, #tpu.memory_space<vmem>>, vector<1x128xf32>,
    %c10_i32 = arith.constant 10 : i32
    %71 = arith.addi %0, %c10_i32 : i32
    %72 = arith.index_cast %71 : i32 to index
    %73 = memref.load %arg1[%72] : memref<16xi32, #tpu.memory_space<smem>>
    %74 = arith.index_cast %73 : i32 to index
    %c0_30 = arith.constant 0 : index
    %c0_31 = arith.constant 0 : index
    %75 = vector.load %arg2[%74, %c0_30, %c0_31] : memref<32x1x128xf32, #tpu.memory_space<vmem>>, vector<1x1x128xf32>
    %76 = vector.shape_cast %75 : vector<1x1x128xf32> to vector<1x128xf32>
    %c10 = arith.constant 10 : index
    %c0_32 = arith.constant 0 : index
    %77 = vector.load %arg3[%c10, %c0_32] : memref<16x128xf32, #tpu.memory_space<vmem>>, vector<1x128xf32>
    tpu.vector_store %arg3[%c10, %c0_32], %76 {strides = array<i32>} : memref<16x128xf32, #tpu.memory_space<vmem>>, vector<1x128xf32>,
    %c11_i32 = arith.constant 11 : i32
    %78 = arith.addi %0, %c11_i32 : i32
    %79 = arith.index_cast %78 : i32 to index
    %80 = memref.load %arg1[%79] : memref<16xi32, #tpu.memory_space<smem>>
    %81 = arith.index_cast %80 : i32 to index
    %c0_33 = arith.constant 0 : index
    %c0_34 = arith.constant 0 : index
    %82 = vector.load %arg2[%81, %c0_33, %c0_34] : memref<32x1x128xf32, #tpu.memory_space<vmem>>, vector<1x1x128xf32>
    %83 = vector.shape_cast %82 : vector<1x1x128xf32> to vector<1x128xf32>
    %c11 = arith.constant 11 : index
    %c0_35 = arith.constant 0 : index
    %84 = vector.load %arg3[%c11, %c0_35] : memref<16x128xf32, #tpu.memory_space<vmem>>, vector<1x128xf32>
    tpu.vector_store %arg3[%c11, %c0_35], %83 {strides = array<i32>} : memref<16x128xf32, #tpu.memory_space<vmem>>, vector<1x128xf32>,
    %c12_i32 = arith.constant 12 : i32
    %85 = arith.addi %0, %c12_i32 : i32
    %86 = arith.index_cast %85 : i32 to index
    %87 = memref.load %arg1[%86] : memref<16xi32, #tpu.memory_space<smem>>
    %88 = arith.index_cast %87 : i32 to index
    %c0_36 = arith.constant 0 : index
    %c0_37 = arith.constant 0 : index
    %89 = vector.load %arg2[%88, %c0_36, %c0_37] : memref<32x1x128xf32, #tpu.memory_space<vmem>>, vector<1x1x128xf32>
    %90 = vector.shape_cast %89 : vector<1x1x128xf32> to vector<1x128xf32>
    %c12 = arith.constant 12 : index
    %c0_38 = arith.constant 0 : index
    %91 = vector.load %arg3[%c12, %c0_38] : memref<16x128xf32, #tpu.memory_space<vmem>>, vector<1x128xf32>
    tpu.vector_store %arg3[%c12, %c0_38], %90 {strides = array<i32>} : memref<16x128xf32, #tpu.memory_space<vmem>>, vector<1x128xf32>,
    %c13_i32 = arith.constant 13 : i32
    %92 = arith.addi %0, %c13_i32 : i32
    %93 = arith.index_cast %92 : i32 to index
    %94 = memref.load %arg1[%93] : memref<16xi32, #tpu.memory_space<smem>>
    %95 = arith.index_cast %94 : i32 to index
    %c0_39 = arith.constant 0 : index
    %c0_40 = arith.constant 0 : index
    %96 = vector.load %arg2[%95, %c0_39, %c0_40] : memref<32x1x128xf32, #tpu.memory_space<vmem>>, vector<1x1x128xf32>
    %97 = vector.shape_cast %96 : vector<1x1x128xf32> to vector<1x128xf32>
    %c13 = arith.constant 13 : index
    %c0_41 = arith.constant 0 : index
    %98 = vector.load %arg3[%c13, %c0_41] : memref<16x128xf32, #tpu.memory_space<vmem>>, vector<1x128xf32>
    tpu.vector_store %arg3[%c13, %c0_41], %97 {strides = array<i32>} : memref<16x128xf32, #tpu.memory_space<vmem>>, vector<1x128xf32>,
    %c14_i32 = arith.constant 14 : i32
    %99 = arith.addi %0, %c14_i32 : i32
    %100 = arith.index_cast %99 : i32 to index
    %101 = memref.load %arg1[%100] : memref<16xi32, #tpu.memory_space<smem>>
    %102 = arith.index_cast %101 : i32 to index
    %c0_42 = arith.constant 0 : index
    %c0_43 = arith.constant 0 : index
    %103 = vector.load %arg2[%102, %c0_42, %c0_43] : memref<32x1x128xf32, #tpu.memory_space<vmem>>, vector<1x1x128xf32>
    %104 = vector.shape_cast %103 : vector<1x1x128xf32> to vector<1x128xf32>
    %c14 = arith.constant 14 : index
    %c0_44 = arith.constant 0 : index
    %105 = vector.load %arg3[%c14, %c0_44] : memref<16x128xf32, #tpu.memory_space<vmem>>, vector<1x128xf32>
    tpu.vector_store %arg3[%c14, %c0_44], %104 {strides = array<i32>} : memref<16x128xf32, #tpu.memory_space<vmem>>, vector<1x128xf32>,
    %c15_i32 = arith.constant 15 : i32
    %106 = arith.addi %0, %c15_i32 : i32
    %107 = arith.index_cast %106 : i32 to index
    %108 = memref.load %arg1[%107] : memref<16xi32, #tpu.memory_space<smem>>
    %109 = arith.index_cast %108 : i32 to index
    %c0_45 = arith.constant 0 : index
    %c0_46 = arith.constant 0 : index
    %110 = vector.load %arg2[%109, %c0_45, %c0_46] : memref<32x1x128xf32, #tpu.memory_space<vmem>>, vector<1x1x128xf32>
    %111 = vector.shape_cast %110 : vector<1x1x128xf32> to vector<1x128xf32>
    %c15 = arith.constant 15 : index
    %c0_47 = arith.constant 0 : index
    %112 = vector.load %arg3[%c15, %c0_47] : memref<16x128xf32, #tpu.memory_space<vmem>>, vector<1x128xf32>
    tpu.vector_store %arg3[%c15, %c0_47], %111 {strides = array<i32>} : memref<16x128xf32, #tpu.memory_space<vmem>>, vector<1x128xf32>,
    return
  }
  func.func @transform_0(%arg0: i32, %arg1: memref<16xi32, #tpu.memory_space<smem>>) -> (i32, i32, i32) {
    %c0_i32 = arith.constant 0 : i32
    %c0_i32_0 = arith.constant 0 : i32
    %c0_i32_1 = arith.constant 0 : i32
    %c0_i32_2 = arith.constant 0 : i32
    return %c0_i32, %c0_i32_0, %c0_i32_1 : i32, i32, i32
  }
  func.func @transform_1(%arg0: i32, %arg1: memref<16xi32, #tpu.memory_space<smem>>) -> (i32, i32) {
    %c0_i32 = arith.constant 0 : i32
    %c0_i32_0 = arith.constant 0 : i32
    return %arg0, %c0_i32 : i32, i32
  }
}

</mosaic_0001>

<bundles_post_ra>
// kernel: word_encoder_forward.1
= control target key start
LH: loop header
LB: loop body
LE: loop exit
PB: predicated region body
PF: predicated region fallthrough
CT: control target
= control target key end

     0   :  { %s295_s0 = inlined_call_operand.vmem [shape: s32[16], index: 0, kind: input, shape index: {}]   ;;  %s296_s1 = inlined_call_operand.hbm [shape: f32[32,1,128], index: 1, kind: input, shape index: {}]   ;;  %s297_s2 = inlined_call_operand.hbm [shape: f32[16,128], index: 2, kind: output, shape index: {}]  }
   0x1   :  { %s7_s11 = sshll.u32 %s295_s0, 4  ;;  %s8_s11 = int_to_ptr.vmem [resolvable:$true] %s7_s11 }
   0x2   :  { %s165_s12 = scalar_lea.vmem %s8_s11, 16  ;;  %p170_p1 = scmp.lt.s32.totalorder %s8_s11, %s8_s11 }
   0x3   :  { %p166_p0 = scmp.ne.s32.totalorder %s8_s11, %s165_s12  ;;  %p171_p2 = scmp.lt.s32.totalorder %s165_s12, %s165_s12 }
   0x5   :  { %p172_p3 = por %p171_p2, %p170_p1 }
   0x7   :  { %p173_p4 = pnand %p172_p3, %p166_p0 }
   0x9   :  { %176 = shalt.err (!%p173_p4)  }
   0xa   :  { %s227_s13 = smov [#allocation3]  }
   0xb   :  { %10 = dma.vmem_to_smem %s8_s11, 16, %s227_s13, [#allocation2] }
   0xc   :  { %221 = dma.done.wait [#allocation2], 16 }
   0xd   :  { %222 = vsyncadd [#allocation2], 4294967280 }
   0xe   :  { %12 = sfence }
   0xf   :  { %13 = vsyncpa [#allocation5], 0 }
  0x10   :  { %14 = vsyncpa [#allocation6], 0  ;;  %s228_s14 = smov [#allocation4]   ;;  %s177_s17 = scalar_lea.hbm %s296_s1, 512 }
  0x11   :  { %s20_s15 = sshll.u32 %s228_s14, 4  ;;  %p178_p5 = scmp.ne.s32.totalorder %s296_s1, %s177_s17  ;;  %s21_s15 = int_to_ptr.vmem [resolvable:$true] %s20_s15 }
  0x12   :  { %p181_p6 = scmp.lt.u32.totalorder %s177_s17, %s296_s1 }
  0x14   :  { %p183_p7 = pnand %p181_p6, %p178_p5 }
  0x16   :  { %186 = shalt.err (!%p183_p7)
}
  0x17   :  { %s187_s22 = scalar_lea.vmem %s21_s15, 512  ;;  %p192_p9 = scmp.lt.s32.totalorder %s21_s15, %s21_s15 }
  0x18   :  { %p188_p8 = scmp.ne.s32.totalorder %s21_s15, %s187_s22  ;;  %p193_p10 = scmp.lt.s32.totalorder %s187_s22, %s187_s22 }
  0x1a   :  { %p194_p11 = por %p193_p10, %p192_p9 }
  0x1c   :  { %p195_p12 = pnand %p194_p11, %p188_p8 }
  0x1e   :  { %198 = shalt.err (!%p195_p12)
}
  0x1f   :  { %s229_s23 = smov 16   ;;  %s230_s24 = smov 1  }
  0x20   :  { %26 = dma.hbm_to_vmem [thread:$0]  %s296_s1, 512, %s21_s15, [#allocation5], %s229_s23, %s229_s23, %s230_s24  }
  0x21   :  { %223 = dma.done.wait [#allocation5], 512  }
  0x22   :  { %224 = vsyncadd [#allocation5], 4294966784  ;;  %s31_s27 = sld [smem:[#allocation3]]  ;;  %s143_s28 = sld [smem:[#allocation3 + $0x1]] }
  0x23   :  { %s144_s29 = sld [smem:[#allocation3 + $0x2]]  ;;  %s145_s30 = sld [smem:[#allocation3 + $0x3]] }
  0x24   :  { %s146_s3 = sld [smem:[#allocation3 + $0x4]]  ;;  %s147_s4 = sld [smem:[#allocation3 + $0x5]] }
  0x25   :  { %s148_s5 = sld [smem:[#allocation3 + $0x6]]  ;;  %s149_s6 = sld [smem:[#allocation3 + $0x7]] }
  0x26   :  { %s264_s7 = sld [smem:[#allocation3 + $0x8]]  ;;  %s266_s8 = sld [smem:[#allocation3 + $0x9]] }
  0x27   :  { %s268_s9 = sld [smem:[#allocation3 + $0xa]]  ;;  %s270_s10 = sld [smem:[#allocation3 + $0xb]] }
  0x28   :  { %s32_s11 = scalar_lea.vmem [#allocation4], %s31_s27  ;;  %s37_s1 = scalar_lea.vmem [#allocation4], %s143_s28 }
  0x29   :  { %v33_v0 = vld [vmem:[%s32_s11] sm:$0x1]  ;;  %s42_s12 = scalar_lea.vmem [#allocation4], %s144_s29  ;;  %s47_s13 = scalar_lea.vmem [#allocation4], %s145_s30 }
  0x2a   :  { %v38_v1 = vld [vmem:[%s37_s1] sm:$0x1]  ;;  %34 = vst [vmem:[#allocation7] sm:$0x1] %v33_v0  ;;  %s52_s14 = scalar_lea.vmem [#allocation4], %s146_s3  ;;  %s57_s15 = scalar_lea.vmem [#allocation4], %s147_s4 }
  0x2b   :  { %39 = vst [vmem:[#allocation7 + $0x1] sm:$0x1] %v38_v1  ;;  %v43_v2 = vld [vmem:[%s42_s12] sm:$0x1]  ;;  %s62_s16 = scalar_lea.vmem [#allocation4], %s148_s5  ;;  %s67_s0 = scalar_lea.vmem [#allocation4], %s149_s6 }
  0x2c   :  { %v48_v3 = vld [vmem:[%s47_s13] sm:$0x1]  ;;  %44 = vst [vmem:[#allocation7 + $0x2] sm:$0x1] %v43_v2  ;;  %s72_s17 = scalar_lea.vmem [#allocation4], %s264_s7  ;;  %s77_s18 = scalar_lea.vmem [#allocation4], %s266_s8 }
  0x2d   :  { %49 = vst [vmem:[#allocation7 + $0x3] sm:$0x1] %v48_v3  ;;  %v53_v4 = vld [vmem:[%s52_s14] sm:$0x1]  ;;  %s82_s19 = scalar_lea.vmem [#allocation4], %s268_s9  ;;  %s87_s20 = scalar_lea.vmem [#allocation4], %s270_s10 }
  0x2e   :  { %v58_v5 = vld [vmem:[%s57_s15] sm:$0x1]  ;;  %54 = vst [vmem:[#allocation7 + $0x4] sm:$0x1] %v53_v4  ;;  %s154_s21 = sld [smem:[#allocation3 + $0xc]]  ;;  %s155_s22 = sld [smem:[#allocation3 + $0xd]] }
  0x2f   :  { %59 = vst [vmem:[#allocation7 + $0x5] sm:$0x1] %v58_v5  ;;  %v63_v6 = vld [vmem:[%s62_s16] sm:$0x1]  ;;  %s156_s23 = sld [smem:[#allocation3 + $0xe]]  ;;  %s157_s24 = sld [smem:[#allocation3 + $0xf]] }
  0x30   :  { %v68_v7 = vld [vmem:[%s67_s0] sm:$0x1]  ;;  %64 = vst [vmem:[#allocation7 + $0x6] sm:$0x1] %v63_v6  ;;  %s231_s25 = smov [#allocation7]  }
  0x31   :  { %69 = vst [vmem:[#allocation7 + $0x7] sm:$0x1] %v68_v7  ;;  %v73_v8 = vld [vmem:[%s72_s17] sm:$0x1]  ;;  %s115_s26 = sshll.u32 %s231_s25, 4  ;;  %s276_s26 = int_to_ptr.vmem [resolvable:$true] %s115_s26 }
  0x32   :  { %v78_v9 = vld [vmem:[%s77_s18] sm:$0x1]  ;;  %74 = vst [vmem:[#allocation7 + $0x8] sm:$0x1] %v73_v8  ;;  %s199_s3 = scalar_lea.vmem %s276_s26, 256  ;;  %p204_p0 = scmp.lt.s32.totalorder %s276_s26, %s276_s26 }
  0x33   :  { %79 = vst [vmem:[#allocation7 + $0x9] sm:$0x1] %v78_v9  ;;  %v83_v10 = vld [vmem:[%s82_s19] sm:$0x1]  ;;  %p200_p13 = scmp.ne.s32.totalorder %s276_s26, %s199_s3  ;;  %p205_p1 = scmp.lt.s32.totalorder %s199_s3, %s199_s3 }
  0x34   :  { %v88_v11 = vld [vmem:[%s87_s20] sm:$0x1]  ;;  %84 = vst [vmem:[#allocation7 + $0xa] sm:$0x1] %v83_v10  ;;  %s92_s27 = scalar_lea.vmem [#allocation4], %s154_s21  ;;  %s97_s28 = scalar_lea.vmem [#allocation4], %s155_s22 }
  0x35   :  { %89 = vst [vmem:[#allocation7 + $0xb] sm:$0x1] %v88_v11  ;;  %v93_v12 = vld [vmem:[%s92_s27] sm:$0x1]  ;;  %s102_s29 = scalar_lea.vmem [#allocation4], %s156_s23  ;;  %s107_s30 = scalar_lea.vmem [#allocation4], %s157_s24 }
  0x36   :  { %94 = vst [vmem:[#allocation7 + $0xc] sm:$0x1] %v93_v12  ;;  %v98_v13 = vld [vmem:[%s97_s28] sm:$0x1]  ;;  %p206_p2 = por %p205_p1, %p204_p0 }
  0x37   :  { %v103_v14 = vld [vmem:[%s102_s29] sm:$0x1]  ;;  %99 = vst [vmem:[#allocation7 + $0xd] sm:$0x1] %v98_v13 }
  0x38   :  { %104 = vst [vmem:[#allocation7 + $0xe] sm:$0x1] %v103_v14  ;;  %v108_v15 = vld [vmem:[%s107_s30] sm:$0x1]  ;;  %p207_p3 = pnand %p206_p2, %p200_p13 }
  0x39   :  { %109 = vst [vmem:[#allocation7 + $0xf] sm:$0x1] %v108_v15 }
  0x3a   :  { %210 = shalt.err (!%p207_p3)
}
  0x3b   :  { %s211_s6 = scalar_lea.hbm %s297_s2, 256 }
  0x3c   :  { %p212_p4 = scmp.ne.s32.totalorder %s297_s2, %s211_s6  ;;  %p215_p5 = scmp.lt.u32.totalorder %s211_s6, %s297_s2 }
  0x3e   :  { %p217_p6 = pnand %p215_p5, %p212_p4 }
  0x40   :  { %220 = shalt.err (!%p217_p6)
}
  0x41   :  { %s232_s11 = smov 128   ;;  %s233_s1 = smov 8  }
  0x42   :  { %121 = dma.vmem_to_hbm [thread:$0]  %s276_s26, 256, %s297_s2, [#allocation6], %s232_s11, %s232_s11, %s233_s1  }
  0x43   :  { %225 = dma.done.wait [#allocation6], 256  }
  0x44   :  { %226 = vsyncadd [#allocation6], 4294967040 }
  0x45   :  { %125 = vsyncpa [#allocation5], 1 }
  0x46   :  { %126 = vsyncpa [#allocation6], 1 }

</bundles_post_ra>
